<compile_context>
chip_gen: v6e
topology: v6e:2x2x1
jax: 0.10.0
libtpu: 0.0.40
codegen_flags: <defaults>
</compile_context>

<pallas_src>
import math
from functools import partial

import jax
import jax.numpy as jnp
from jax.experimental import pallas as pl
from jax.experimental.pallas import tpu as pltpu


def _embed_gather_kernel(tok_ref, emb_hbm, out_ref, buf, sem, *, scale, chunk):
    """Gather `chunk` embedding rows for grid step i and scale them.

    tok_ref : (n_pad,) int32 in SMEM (scalar-prefetched token ids)
    emb_hbm : (vocab, emb_size) table left in HBM (pl.ANY)
    out_ref : (chunk, emb_size) output tile in VMEM
    buf     : (chunk, emb_size) VMEM scratch (gather destination)
    sem     : DMA semaphore shared by all row copies of this chunk
    """
    base = pl.program_id(0) * chunk

    # Issue all row DMAs for this chunk; they stay in flight concurrently so
    # per-row latency is hidden.
    @pl.loop(0, chunk)
    def _issue(j):
        row = tok_ref[base + j]
        pltpu.make_async_copy(
            emb_hbm.at[pl.ds(row, 1)],   # (1, emb_size) row in HBM
            buf.at[pl.ds(j, 1)],         # (1, emb_size) row in VMEM
            sem,
        ).start()

    # Wait for all of them (same-sized descriptors against the shared sem).
    @pl.loop(0, chunk)
    def _wait(j):
        pltpu.make_async_copy(
            emb_hbm.at[pl.ds(0, 1)], buf.at[pl.ds(0, 1)], sem).wait()

    # Fused sqrt(emb_size) scaling; output writeback is pipelined by Pallas.
    out_ref[...] = (buf[...] * scale).astype(out_ref.dtype)


def _pick_chunk(n, target=256):
    """Choose tokens-per-grid-step.  Prefer a divisor of n (multiple of 8,
    <= target) so no output padding/slicing pass is needed."""
    if n <= target:
        return n, n                      # single chunk covers everything
    for c in range(target, 7, -8):
        if n % c == 0:
            return c, n                  # exact tiling, no padding
    c = target
    return c, pl.cdiv(n, c) * c          # fall back to padding the id vector


def token_embedding(tokens, embedding_table, *, target_chunk=256):
    """tokens: int array (seq_len, batch); embedding_table: (vocab, emb_size).

    Returns embedding_table[tokens] * sqrt(emb_size), shape
    (seq_len, batch, emb_size), same as the PyTorch TokenEmbedding.forward.
    """
    seq_len, batch = tokens.shape
    vocab, emb_size = embedding_table.shape
    scale = float(math.sqrt(emb_size))
    n = seq_len * batch

    # Clamp ids so a stray value can never turn into an OOB HBM read.
    tok_flat = jnp.clip(tokens.reshape(n).astype(jnp.int32), 0, vocab - 1)

    chunk, n_pad = _pick_chunk(n, target_chunk)
    if n_pad != n:
        # Only the 4-byte-per-token id vector is padded (cheap); padded ids
        # gather row 0, and those output rows are sliced off below.
        tok_flat = jnp.pad(tok_flat, (0, n_pad - n))

    grid = (n_pad // chunk,)

    out = pl.pallas_call(
        partial(_embed_gather_kernel, scale=scale, chunk=chunk),
        out_shape=jax.ShapeDtypeStruct((n_pad, emb_size), embedding_table.dtype),
        grid_spec=pltpu.PrefetchScalarGridSpec(
            num_scalar_prefetch=1,                      # token ids -> SMEM
            grid=grid,
            in_specs=[
                pl.BlockSpec(memory_space=pl.ANY),      # table stays in HBM
            ],
            out_specs=pl.BlockSpec((chunk, emb_size), lambda i, tok: (i, 0)),
            scratch_shapes=[
                pltpu.VMEM((chunk, emb_size), embedding_table.dtype),
                pltpu.SemaphoreType.DMA(()),
            ],
        ),
        compiler_params=pltpu.CompilerParams(
            dimension_semantics=("parallel",)),         # v7x: shard chunks over 2 TCs
    )(tok_flat, embedding_table)

    if n_pad != n:
        out = out[:n]
    return out.reshape(seq_len, batch, emb_size)


if __name__ == "__main__":
    # small shapes consistent with the module: vocab=32, emb_size=32,
    # tokens of shape (seq_len=8, batch=2)
    vocab_size = 32
    emb_size = 32
    seq_len, batch = 8, 2

    key = jax.random.PRNGKey(0)
    k_tok, k_emb = jax.random.split(key)

    tokens = jax.random.randint(k_tok, (seq_len, batch), 0, vocab_size,
                                dtype=jnp.int32)
    # nn.Embedding default init: N(0, 1)
    embedding_table = jax.random.normal(k_emb, (vocab_size, emb_size),
                                        dtype=jnp.float32)

    out = token_embedding(tokens, embedding_table)
    out = jax.block_until_ready(out)

    # reference check: plain-JAX gather * sqrt(emb_size)
    ref = embedding_table[tokens] * math.sqrt(emb_size)
    assert out.shape == (seq_len, batch, emb_size)
    assert jnp.allclose(out, ref, atol=1e-5, rtol=1e-5)

    print("KERNEL_OK")
</pallas_src>

<mosaic_0001>
module attributes {stable_mosaic.version = 11 : i64} {
  func.func @_embed_gather_kernel(%arg0: i32, %arg1: memref<16xi32, #tpu.memory_space<smem>>, %arg2: memref<32x32xf32, #tpu.memory_space<any>>, %arg3: memref<16x32xf32, #tpu.memory_space<vmem>>, %arg4: memref<16x32xf32, #tpu.memory_space<vmem>>, %arg5: memref<!tpu.dma_semaphore, #tpu.memory_space<semaphore_mem>>) attributes {dimension_semantics = [#tpu.dimension_semantics<parallel>], iteration_bounds = array<i64: 1>, scalar_prefetch = 1 : i64, scratch_operands = 2 : i64, tpu.core_type = #tpu.core_type<tc>, window_params = [{}, {transform_indices = @transform_1, window_bounds = array<i64: 16, 32>}]} {
    %c16_i32 = arith.constant 16 : i32
    %0 = arith.muli %arg0, %c16_i32 : i32
    %c0_i32 = arith.constant 0 : i32
    %c16_i32_0 = arith.constant 16 : i32
    %1 = arith.addi %c0_i32, %c16_i32_0 : i32
    %c1_i32 = arith.constant 1 : i32
    scf.for %arg6 = %c0_i32 to %1 step %c1_i32  : i32 {
      %c1_i32_8 = arith.constant 1 : i32
      %7 = arith.muli %arg6, %c1_i32_8 : i32
      %c0_i32_9 = arith.constant 0 : i32
      %8 = arith.addi %c0_i32_9, %7 : i32
      %9 = arith.addi %0, %8 : i32
      %10 = arith.index_cast %9 : i32 to index
      %11 = memref.load %arg1[%10] : memref<16xi32, #tpu.memory_space<smem>>
      %c0_i32_10 = arith.constant 0 : i32
      %12 = tpu.memref_slice %arg2[%11, %c0_i32_10] : memref<32x32xf32, #tpu.memory_space<any>> -> memref<1x32xf32, #tpu.memory_space<any>>
      %c0_i32_11 = arith.constant 0 : i32
      %13 = tpu.memref_slice %arg4[%8, %c0_i32_11] : memref<16x32xf32, #tpu.memory_space<vmem>> -> memref<1x32xf32, #tpu.memory_space<vmem>>
      tpu.enqueue_dma source(%12 : memref<1x32xf32, #tpu.memory_space<any>>) target(%13 : memref<1x32xf32, #tpu.memory_space<vmem>>) target_semaphore(%arg5 : memref<!tpu.dma_semaphore, #tpu.memory_space<semaphore_mem>>)
    }
    %c16_i32_1 = arith.constant 16 : i32
    %c0_i32_2 = arith.constant 0 : i32
    %c16_i32_3 = arith.constant 16 : i32
    %2 = arith.addi %c0_i32_2, %c16_i32_3 : i32
    %c1_i32_4 = arith.constant 1 : i32
    scf.for %arg6 = %c0_i32_2 to %2 step %c1_i32_4  : i32 {
      %c0_i32_8 = arith.constant 0 : i32
      %c0_i32_9 = arith.constant 0 : i32
      %7 = tpu.memref_slice %arg2[%c0_i32_8, %c0_i32_9] : memref<32x32xf32, #tpu.memory_space<any>> -> memref<1x32xf32, #tpu.memory_space<any>>
      %c0_i32_10 = arith.constant 0 : i32
      %c0_i32_11 = arith.constant 0 : i32
      %8 = tpu.memref_slice %arg4[%c0_i32_10, %c0_i32_11] : memref<16x32xf32, #tpu.memory_space<vmem>> -> memref<1x32xf32, #tpu.memory_space<vmem>>
      tpu.wait_dma2 semaphore(%arg5 : memref<!tpu.dma_semaphore, #tpu.memory_space<semaphore_mem>>) src(%7 : memref<1x32xf32, #tpu.memory_space<any>>) dst(%8 : memref<1x32xf32, #tpu.memory_space<vmem>>)
    }
    %c0 = arith.constant 0 : index
    %c0_5 = arith.constant 0 : index
    %3 = vector.load %arg4[%c0, %c0_5] : memref<16x32xf32, #tpu.memory_space<vmem>>, vector<16x32xf32>
    %cst = arith.constant 5.65685415 : f32
    %4 = vector.broadcast %cst : f32 to vector<16x32xf32>
    %5 = arith.mulf %3, %4 : vector<16x32xf32>
    %c0_6 = arith.constant 0 : index
    %c0_7 = arith.constant 0 : index
    %6 = vector.load %arg3[%c0_6, %c0_7] : memref<16x32xf32, #tpu.memory_space<vmem>>, vector<16x32xf32>
    tpu.vector_store %arg3[%c0_6, %c0_7], %5 {strides = array<i32>} : memref<16x32xf32, #tpu.memory_space<vmem>>, vector<16x32xf32>,
    return
  }
  func.func @transform_1(%arg0: i32, %arg1: memref<16xi32, #tpu.memory_space<smem>>) -> (i32, i32) {
    %c0_i32 = arith.constant 0 : i32
    %c0_i32_0 = arith.constant 0 : i32
    return %arg0, %c0_i32 : i32, i32
  }
}

</mosaic_0001>

<bundles_post_ra>
// kernel: tpu_custom_call.1
= control target key start
LH: loop header
LB: loop body
LE: loop exit
PB: predicated region body
PF: predicated region fallthrough
CT: control target
= control target key end

     0   :  { %s180_s9 = smov [#allocation5]   ;;  %s225_s0 = inlined_call_operand.hbm [shape: s32[16], index: 0, kind: input, shape index: {}]   ;;  %s226_s1 = inlined_call_operand.hbm [shape: f32[32,32], index: 1, kind: input, shape index: {}]   ;;  %s227_s2 = inlined_call_operand.hbm [shape: f32[16,32], index: 2, kind: output, shape index: {}]  }
   0x1   :  { %8 = dma.hbm_to_smem %s225_s0, 16, %s180_s9, [#allocation4] }
   0x2   :  { %166 = dma.done.wait [#allocation4], 16 }
   0x3   :  { %167 = vsyncadd [#allocation4], 4294967280 }
   0x4   :  { %10 = sfence }
   0x5   :  { %11 = vsyncpa [#allocation7], 0  ;;  %s203_s12 = smov 0  }
   0x6 LB: > { %s20_s13 = sld [smem:[#allocation5 + %s174_s12]]  ;;  %s23_s14 = scalar_lea.vmem [#allocation2], %s174_s12  ;;  %s174_s12 = sphi %s203_s12, %s18_s12  }
   0x7   : > { %s31_s15 = sshll.u32 %s23_s14, 4  ;;  %s118_s22 = scalar_lea.hbm %s226_s1, 512  ;;  %s32_s15 = int_to_ptr.vmem [resolvable:$true] %s31_s15 }
   0xc   : > { %s86_s16 = sshll.u32 %s20_s13, 4 }
   0xd   : > { %s22_s18 = scalar_lea.hbm %s226_s1, %s86_s16 }
   0xe   : > { %s116_s19 = scalar_lea.hbm %s22_s18, 16  ;;  %p119_p1 = scmp.lt.s32.totalorder %s22_s18, %s226_s1 }
   0xf   : > { %p117_p0 = scmp.ne.s32.totalorder %s22_s18, %s116_s19  ;;  %p120_p2 = scmp.lt.s32.totalorder %s118_s22, %s116_s19 }
  0x11   : > { %p121_p3 = por %p120_p2, %p119_p1 }
  0x13   : > { %p122_p4 = pnand %p121_p3, %p117_p0 }
  0x15   : > { %125 = shalt.err (!%p122_p4)  }
  0x16   : > { %s126_s25 = scalar_lea.vmem %s32_s15, 16  ;;  %s181_s26 = smov [#allocation2]  }
  0x17   : > { %p127_p5 = scmp.ne.s32.totalorder %s32_s15, %s126_s25  ;;  %s128_s27 = sshll.u32 %s181_s26, 4  ;;  %s129_s27 = int_to_ptr.vmem [resolvable:$false] %s128_s27 }
  0x18   : > { %s130_s28 = scalar_lea.vmem %s129_s27, 256  ;;  %p131_p6 = scmp.lt.s32.totalorder %s32_s15, %s129_s27 }
  0x19   : > { %p132_p7 = scmp.lt.s32.totalorder %s130_s28, %s126_s25 }
  0x1b   : > { %p133_p8 = por %p132_p7, %p131_p6 }
  0x1d   : > { %p134_p9 = pnand %p133_p8, %p127_p5 }
  0x1f   : > { %137 = shalt.err (!%p134_p9)  }
  0x20   : > { %34 = dma.hbm_to_vmem [thread:$0]  %s22_s18, 16, %s32_s15, [#allocation3] }
  0x21   : > { %s18_s12 = sadd.s32 1, %s174_s12  }
  0x22   : > { %p15_p10 = scmp.ge.s32.totalorder %s18_s12, 16  }
  0x23   :  { %s176_s29 = smov (%p15_p10), 0  }
  0x24   :  { %17 = sbr.rel (!%p15_p10) target bundleno = 6 (0x6), region = 40 }
  0x29 LB: > { %168 = dma.done.wait [#allocation3], 16  ;;  %s178_s29 = sphi %s176_s29, %s40_s29  }
  0x2a   : > { %169 = vsyncadd [#allocation3], 4294967280  ;;  %s40_s29 = sadd.s32 1, %s178_s29  }
  0x2b   : > { %p37_p11 = scmp.ge.s32.totalorder %s40_s29, 16  }
  0x2c   :  { %v44_v0 = vld [vmem:[#allocation2] sm:$0xff] (%p37_p11)  ;;  %vm48_vm0 = vcmask (%p37_p11), 261120   ;;  %v45_v1 = vld [vmem:[#allocation2 + $0x8] sm:$0xff] (%p37_p11)  ;;  %s182_s30 = smov (%p37_p11), [#allocation6]  }
  0x2d   :  { %39 = sbr.rel (!%p37_p11) target bundleno = 41 (0x29), region = 51  ;;  %v46_v2 = vmul.f32 (%p37_p11), 5.656854, %v44_v0  ;;  %v47_v3 = vmul.f32 (%p37_p11), 5.656854, %v45_v1  ;;  %s56_s3 = sshll.u32 (%p37_p11), %s182_s30, 4  ;;  %s57_s3 = int_to_ptr.vmem [resolvable:$true] %s56_s3 }
  0x2e   :  { %s138_s1 = scalar_lea.vmem (%p37_p11), %s57_s3, 256  ;;  %p143_p13 = scmp.lt.s32.totalorder (%p37_p11), %s57_s3, %s57_s3 }
  0x2f   :  { %49 = vst.msk [vmem:[#allocation6] sm:$0xff] (%p37_p11), %vm48_vm0, %v46_v2  ;;  %50 = vst.msk [vmem:[#allocation6 + $0x8] sm:$0xff] (%p37_p11), %vm48_vm0, %v47_v3  ;;  %p139_p12 = scmp.ne.s32.totalorder (%p37_p11), %s57_s3, %s138_s1  ;;  %p144_p0 = scmp.lt.s32.totalorder (%p37_p11), %s138_s1, %s138_s1 }
  0x31   :  { %p145_p1 = por (%p37_p11), %p144_p0, %p143_p13 }
  0x33   :  { %p146_p2 = pnand %p145_p1, %p139_p12 }
  0x35   :  { %149 = shalt.err (!%p146_p2)
}
  0x36   :  { %s183_s4 = smov 128   ;;  %s184_s5 = smov 8  }
  0x37   :  { %62 = dma.vmem_to_hbm [thread:$0]  %s57_s3, 256, %s227_s2, [#allocation7], %s183_s4, %s183_s4, %s184_s5  }
  0x38   :  { %170 = dma.done.wait [#allocation7], 256  }
  0x39   :  { %171 = vsyncadd [#allocation7], 4294967040 }
  0x3a   :  { %66 = vsyncpa [#allocation7], 1 }
  0x3b   :  { %67 = vsyncmov [#allocation3] }
  0x3e   :  { %s68_s8 = vpop.sfrf %67 }
  0x3f   :  { %p87_p3 = scmp.ne.s32.totalorder %s68_s8, 0 }
  0x41   :  { %72 = shalt.err (%p87_p3)  }

</bundles_post_ra>
